<compile_context>
chip_gen: v5e
topology: v5e:2x2
jax: 0.10.0
libtpu: 0.0.40
codegen_flags: <defaults>
</compile_context>

<pallas_src>
import functools

import jax
import jax.numpy as jnp
from jax import lax
from jax.experimental import pallas as pl
from jax.experimental.pallas import tpu as pltpu


# ----------------------------------------------------------------------------
# Pallas kernels
# ----------------------------------------------------------------------------
def pw_conv_bn_kernel(x_ref, w_ref, s_ref, b_ref, o_ref, *, relu):
    """1x1 (grouped) conv as matmul with block-diagonal weight, fused BN(+ReLU).
    Channel shuffle is pre-folded into the weight columns."""
    acc = jnp.dot(x_ref[...], w_ref[...], preferred_element_type=jnp.float32)
    acc = acc * s_ref[...] + b_ref[...]
    if relu:
        acc = jnp.maximum(acc, 0.0)
    o_ref[...] = acc


def pw_conv_bn_shortcut_kernel(x_ref, w_ref, s_ref, b_ref, sc_ref, *o_refs,
                               concat, with_pre):
    """conv3 (1x1 grouped, block-diag weight) + BN3 + shortcut + ReLU, fused.

    concat=False: pre = conv(x)*s+b + shortcut   (residual, stride=1)
    concat=True : pre = concat([conv(x)*s+b, shortcut], -1)  (stride=2)
    out = relu(pre); pre is written only when with_pre (is_last)."""
    acc = jnp.dot(x_ref[...], w_ref[...], preferred_element_type=jnp.float32)
    acc = acc * s_ref[...] + b_ref[...]
    if concat:
        pre = jnp.concatenate([acc, sc_ref[...]], axis=-1)
    else:
        pre = acc + sc_ref[...]
    o_refs[0][...] = jnp.maximum(pre, 0.0)
    if with_pre:
        o_refs[1][...] = pre


def dw_conv_bn_kernel(x_ref, w_ref, s_ref, b_ref, o_ref, xp_ref, *, relu):
    """Depthwise 3x3 conv (stride 1, padding 1), fused BN (+ReLU).

    The zero-padded halo is assembled in a VMEM scratch buffer (no HBM pad)."""
    _, H, W, C = x_ref.shape
    xp_ref[...] = jnp.zeros_like(xp_ref)
    xp_ref[1:H + 1, 1:W + 1, :] = x_ref[0]
    acc = jnp.zeros((H, W, C), jnp.float32)
    for kh in range(3):
        for kw in range(3):
            acc = acc + xp_ref[kh:kh + H, kw:kw + W, :] * w_ref[kh, kw, :]
    acc = acc * s_ref[0] + b_ref[0]
    if relu:
        acc = jnp.maximum(acc, 0.0)
    o_ref[0] = acc


# ----------------------------------------------------------------------------
# Pallas wrappers
# ----------------------------------------------------------------------------
_PARALLEL_1D = pltpu.CompilerParams(dimension_semantics=("parallel",))


def _row_tile(M, tile_m):
    """Pick a row tile: whole extent for small M, else a multiple-of-8 tile."""
    return M if M <= tile_m else tile_m


def pw_conv_bn(x2d, w, scale, bias, *, relu, tile_m=512):
    M, K = x2d.shape
    Cout = w.shape[1]
    tm = _row_tile(M, tile_m)
    kernel = functools.partial(pw_conv_bn_kernel, relu=relu)
    return pl.pallas_call(
        kernel,
        out_shape=jax.ShapeDtypeStruct((M, Cout), jnp.float32),
        grid=(pl.cdiv(M, tm),),
        in_specs=[
            pl.BlockSpec((tm, K), lambda i: (i, 0)),
            pl.BlockSpec((K, Cout), lambda i: (0, 0)),
            pl.BlockSpec((1, Cout), lambda i: (0, 0)),
            pl.BlockSpec((1, Cout), lambda i: (0, 0)),
        ],
        out_specs=pl.BlockSpec((tm, Cout), lambda i: (i, 0)),
        compiler_params=_PARALLEL_1D,
    )(x2d, w, scale.reshape(1, Cout), bias.reshape(1, Cout))


def pw_conv_bn_shortcut(x2d, w, scale, bias, shortcut2d, *, concat, with_pre,
                        tile_m=512):
    M, K = x2d.shape
    Cout = w.shape[1]
    Cs = shortcut2d.shape[1]
    Ct = Cout + Cs if concat else Cout
    tm = _row_tile(M, tile_m)
    kernel = functools.partial(pw_conv_bn_shortcut_kernel, concat=concat,
                               with_pre=with_pre)
    shape = jax.ShapeDtypeStruct((M, Ct), jnp.float32)
    spec = pl.BlockSpec((tm, Ct), lambda i: (i, 0))
    out_shape = (shape, shape) if with_pre else shape
    out_specs = (spec, spec) if with_pre else spec
    result = pl.pallas_call(
        kernel,
        out_shape=out_shape,
        grid=(pl.cdiv(M, tm),),
        in_specs=[
            pl.BlockSpec((tm, K), lambda i: (i, 0)),
            pl.BlockSpec((K, Cout), lambda i: (0, 0)),
            pl.BlockSpec((1, Cout), lambda i: (0, 0)),
            pl.BlockSpec((1, Cout), lambda i: (0, 0)),
            pl.BlockSpec((tm, Cs), lambda i: (i, 0)),
        ],
        out_specs=out_specs,
        compiler_params=_PARALLEL_1D,
    )(x2d, w, scale.reshape(1, Cout), bias.reshape(1, Cout), shortcut2d)
    if with_pre:
        return result[0], result[1]
    return result, None


def dw_conv3x3_bn(x_nhwc, w33c, scale, bias, *, relu):
    """Stride-1 depthwise 3x3 conv, padding=1, fused BN(+ReLU). Grid over N."""
    N, H, W, C = x_nhwc.shape
    kernel = functools.partial(dw_conv_bn_kernel, relu=relu)
    return pl.pallas_call(
        kernel,
        out_shape=jax.ShapeDtypeStruct((N, H, W, C), jnp.float32),
        grid=(N,),
        in_specs=[
            pl.BlockSpec((1, H, W, C), lambda n: (n, 0, 0, 0)),
            pl.BlockSpec((3, 3, C), lambda n: (0, 0, 0)),
            pl.BlockSpec((1, C), lambda n: (0, 0)),
            pl.BlockSpec((1, C), lambda n: (0, 0)),
        ],
        out_specs=pl.BlockSpec((1, H, W, C), lambda n: (n, 0, 0, 0)),
        scratch_shapes=[pltpu.VMEM((H + 2, W + 2, C), jnp.float32)],
        compiler_params=_PARALLEL_1D,
    )(x_nhwc, w33c, scale.reshape(1, C), bias.reshape(1, C))


# ----------------------------------------------------------------------------
# Weight preparation (static, done once)
# ----------------------------------------------------------------------------
def grouped_1x1_to_dense(w, groups):
    """PyTorch OIHW grouped 1x1 weight [Cout, Cin/g, 1, 1] -> dense [Cin, Cout]
    block-diagonal matrix so the grouped conv becomes one matmul."""
    Cout, Cin_g = w.shape[0], w.shape[1]
    Cin = Cin_g * groups
    Cout_g = Cout // groups
    dense = jnp.zeros((Cin, Cout), jnp.float32)
    for gi in range(groups):
        blk = w[gi * Cout_g:(gi + 1) * Cout_g, :, 0, 0]  # [Cout_g, Cin_g]
        dense = dense.at[gi * Cin_g:(gi + 1) * Cin_g,
                         gi * Cout_g:(gi + 1) * Cout_g].set(blk.T)
    return dense


def shuffle_perm(C, g):
    """shuffled[:, j] = original[:, perm[j]] for the (g, C/g)->(C/g, g) shuffle."""
    j = jnp.arange(C)
    return (j % g) * (C // g) + j // g


# ----------------------------------------------------------------------------
# Bottleneck forward
# ----------------------------------------------------------------------------
def bottleneck_forward(x_nchw, params, *, in_planes, out_planes, stride, groups,
                       is_last=False):
    eps = 1e-5
    mid = out_planes // 4
    g1 = 1 if in_planes == 24 else groups
    N, Cin, H, W = x_nchw.shape
    assert Cin == in_planes
    if stride == 1:
        assert in_planes == out_planes

    x = jnp.transpose(x_nchw, (0, 2, 3, 1)).astype(jnp.float32)  # NHWC
    x2d = x.reshape(N * H * W, Cin)

    def fold_bn(p):
        gamma, beta, mean, var = p
        scale = gamma / jnp.sqrt(var + eps)
        return scale, beta - mean * scale

    s1, b1 = fold_bn(params["bn1"])
    s2, b2 = fold_bn(params["bn2"])
    s3, b3 = fold_bn(params["bn3"])

    # Grouped 1x1 -> dense block-diagonal; fold channel shuffle into conv1's
    # output columns (and its BN scale/bias) -> shuffle is free at runtime.
    w1d = grouped_1x1_to_dense(params["w1"], g1)                 # [Cin, mid]
    perm = shuffle_perm(mid, g1)
    w1d, s1, b1 = w1d[:, perm], s1[perm], b1[perm]
    w3d = grouped_1x1_to_dense(params["w3"], groups)             # [mid, out_planes]
    w2 = jnp.transpose(params["w2"][:, 0, :, :], (1, 2, 0))      # [3, 3, mid]

    # conv1 (grouped 1x1) + bn1 + relu + shuffle  -- MXU, tiled over rows.
    o1 = pw_conv_bn(x2d, w1d, s1, b1, relu=True)                 # [M, mid]

    # conv2 depthwise 3x3 + bn2 + relu -- VPU. Stride-2 is stride-1 + subsample
    # (identical values at sampled positions).  TODO(synk): strided in-kernel.
    o2 = dw_conv3x3_bn(o1.reshape(N, H, W, mid), w2, s2, b2, relu=True)
    if stride == 2:
        o2 = o2[:, ::2, ::2, :]
    Ho, Wo = o2.shape[1], o2.shape[2]
    M2 = N * Ho * Wo

    # Shortcut path.
    if stride == 2:
        # AvgPool2d(3, stride=2, padding=1) with count_include_pad=True -> /9.
        avg_w = jnp.full((3, 3, Cin), 1.0 / 9.0, jnp.float32)
        res = dw_conv3x3_bn(x, avg_w, jnp.ones((Cin,), jnp.float32),
                            jnp.zeros((Cin,), jnp.float32), relu=False)
        res = res[:, ::2, ::2, :]
        shortcut2d = res.reshape(M2, Cin)
        concat = True
        Ct = out_planes + Cin
    else:
        shortcut2d = x2d
        concat = False
        Ct = out_planes

    # conv3 (grouped 1x1) + bn3 + shortcut (add / concat) + relu, fused -- MXU.
    out2d, pre2d = pw_conv_bn_shortcut(o2.reshape(M2, mid), w3d, s3, b3,
                                       shortcut2d, concat=concat,
                                       with_pre=is_last)

    out = jnp.transpose(out2d.reshape(N, Ho, Wo, Ct), (0, 3, 1, 2))
    if is_last:
        pre = jnp.transpose(pre2d.reshape(N, Ho, Wo, Ct), (0, 3, 1, 2))
        return out, pre
    return out


# ----------------------------------------------------------------------------
# Pure-JAX reference (eval-mode BN), for validation
# ----------------------------------------------------------------------------
def reference(x, params, *, in_planes, out_planes, stride, groups):
    eps = 1e-5
    mid = out_planes // 4
    g1 = 1 if in_planes == 24 else groups
    dn = ("NCHW", "OIHW", "NCHW")

    def bn(y, p):
        gamma, beta, mean, var = p
        inv = lax.rsqrt(var + eps)
        return (gamma * inv)[None, :, None, None] * (
            y - mean[None, :, None, None]) + beta[None, :, None, None]

    out = lax.conv_general_dilated(x, params["w1"], (1, 1), "VALID",
                                   feature_group_count=g1, dimension_numbers=dn)
    out = jax.nn.relu(bn(out, params["bn1"]))
    N, C, H, W = out.shape
    out = out.reshape(N, g1, C // g1, H, W).transpose(0, 2, 1, 3, 4).reshape(
        N, C, H, W)
    out = lax.conv_general_dilated(out, params["w2"], (stride, stride),
                                   ((1, 1), (1, 1)), feature_group_count=mid,
                                   dimension_numbers=dn)
    out = jax.nn.relu(bn(out, params["bn2"]))
    out = lax.conv_general_dilated(out, params["w3"], (1, 1), "VALID",
                                   feature_group_count=groups,
                                   dimension_numbers=dn)
    out = bn(out, params["bn3"])
    if stride == 2:
        res = lax.reduce_window(x, 0.0, lax.add, (1, 1, 3, 3), (1, 1, 2, 2),
                                ((0, 0), (0, 0), (1, 1), (1, 1))) / 9.0
        pre = jnp.concatenate([out, res], axis=1)
    else:
        pre = out + x
    return jax.nn.relu(pre), pre


# ----------------------------------------------------------------------------
# Main
# ----------------------------------------------------------------------------
def make_params(key, in_planes, out_planes, groups):
    mid = out_planes // 4
    g1 = 1 if in_planes == 24 else groups
    ks = jax.random.split(key, 16)

    def bn_params(k, c):
        k1, k2, k3, k4 = jax.random.split(k, 4)
        gamma = 1.0 + 0.1 * jax.random.normal(k1, (c,), jnp.float32)
        beta = 0.1 * jax.random.normal(k2, (c,), jnp.float32)
        mean = 0.1 * jax.random.normal(k3, (c,), jnp.float32)
        var = jax.random.uniform(k4, (c,), jnp.float32, 0.5, 1.5)
        return (gamma, beta, mean, var)

    return {
        "w1": 0.2 * jax.random.normal(ks[0], (mid, in_planes // g1, 1, 1), jnp.float32),
        "w2": 0.2 * jax.random.normal(ks[1], (mid, 1, 3, 3), jnp.float32),
        "w3": 0.2 * jax.random.normal(ks[2], (out_planes, mid // groups, 1, 1), jnp.float32),
        "bn1": bn_params(ks[3], mid),
        "bn2": bn_params(ks[4], mid),
        "bn3": bn_params(ks[5], out_planes),
    }


if __name__ == "__main__":
    key = jax.random.PRNGKey(0)
    k_x, k_p = jax.random.split(key)

    in_planes, out_planes, groups = 32, 32, 4
    N, H, W = 2, 8, 8
    x = jax.random.normal(k_x, (N, in_planes, H, W), jnp.float32)
    params = make_params(k_p, in_planes, out_planes, groups)

    # stride = 1 (residual add path), is_last=True returns (out, preact)
    out1, pre1 = bottleneck_forward(x, params, in_planes=in_planes,
                                    out_planes=out_planes, stride=1,
                                    groups=groups, is_last=True)
    out1 = jax.block_until_ready(out1)
    pre1 = jax.block_until_ready(pre1)
    ref_out1, ref_pre1 = reference(x, params, in_planes=in_planes,
                                   out_planes=out_planes, stride=1, groups=groups)
    assert jnp.allclose(out1, ref_out1, atol=1e-4, rtol=1e-4)
    assert jnp.allclose(pre1, ref_pre1, atol=1e-4, rtol=1e-4)

    # stride = 2 (avgpool shortcut + channel concat path)
    out2 = bottleneck_forward(x, params, in_planes=in_planes,
                              out_planes=out_planes, stride=2,
                              groups=groups, is_last=False)
    out2 = jax.block_until_ready(out2)
    ref_out2, _ = reference(x, params, in_planes=in_planes,
                            out_planes=out_planes, stride=2, groups=groups)
    assert out2.shape == (N, out_planes + in_planes, H // 2, W // 2)
    assert jnp.allclose(out2, ref_out2, atol=1e-4, rtol=1e-4)

    print("KERNEL_OK")
</pallas_src>

<mosaic_0001>
module attributes {stable_mosaic.version = 11 : i64} {
  func.func @pw_conv_bn_kernel(%arg0: i32, %arg1: memref<128x32xf32, #tpu.memory_space<vmem>>, %arg2: memref<32x8xf32, #tpu.memory_space<vmem>>, %arg3: memref<1x8xf32, #tpu.memory_space<vmem>>, %arg4: memref<1x8xf32, #tpu.memory_space<vmem>>, %arg5: memref<128x8xf32, #tpu.memory_space<vmem>>) attributes {dimension_semantics = [#tpu.dimension_semantics<parallel>], iteration_bounds = array<i64: 1>, scalar_prefetch = 0 : i64, scratch_operands = 0 : i64, tpu.core_type = #tpu.core_type<tc>, window_params = [{transform_indices = @transform_0, window_bounds = array<i64: 128, 32>}, {pipeline_mode = #tpu.pipeline_mode<synchronous>, transform_indices = @transform_1, window_bounds = array<i64: 32, 8>}, {pipeline_mode = #tpu.pipeline_mode<synchronous>, transform_indices = @transform_2, window_bounds = array<i64: 1, 8>}, {pipeline_mode = #tpu.pipeline_mode<synchronous>, transform_indices = @transform_3, window_bounds = array<i64: 1, 8>}, {transform_indices = @transform_4, window_bounds = array<i64: 128, 8>}]} {
    %c0 = arith.constant 0 : index
    %c0_0 = arith.constant 0 : index
    %0 = vector.load %arg1[%c0, %c0_0] : memref<128x32xf32, #tpu.memory_space<vmem>>, vector<128x32xf32>
    %c0_1 = arith.constant 0 : index
    %c0_2 = arith.constant 0 : index
    %1 = vector.load %arg2[%c0_1, %c0_2] : memref<32x8xf32, #tpu.memory_space<vmem>>, vector<32x8xf32>
    %cst = arith.constant dense<0.000000e+00> : vector<128x8xf32>
    %2 = tpu.matmul %0, %1, %cst {dimension_numbers = #tpu.dot_dimension_numbers<[1], [0], [0], [1], [0, 0, 1, 1], [], []>} : vector<128x32xf32>, vector<32x8xf32>, vector<128x8xf32> -> vector<128x8xf32>
    %c0_3 = arith.constant 0 : index
    %c0_4 = arith.constant 0 : index
    %3 = vector.load %arg3[%c0_3, %c0_4] : memref<1x8xf32, #tpu.memory_space<vmem>>, vector<1x8xf32>
    %4 = vector.broadcast %3 : vector<1x8xf32> to vector<128x8xf32>
    %5 = arith.mulf %2, %4 : vector<128x8xf32>
    %c0_5 = arith.constant 0 : index
    %c0_6 = arith.constant 0 : index
    %6 = vector.load %arg4[%c0_5, %c0_6] : memref<1x8xf32, #tpu.memory_space<vmem>>, vector<1x8xf32>
    %7 = vector.broadcast %6 : vector<1x8xf32> to vector<128x8xf32>
    %8 = arith.addf %5, %7 : vector<128x8xf32>
    %cst_7 = arith.constant 0.000000e+00 : f32
    %9 = vector.broadcast %cst_7 : f32 to vector<128x8xf32>
    %10 = arith.maximumf %8, %9 : vector<128x8xf32>
    %c0_8 = arith.constant 0 : index
    %c0_9 = arith.constant 0 : index
    %11 = vector.load %arg5[%c0_8, %c0_9] : memref<128x8xf32, #tpu.memory_space<vmem>>, vector<128x8xf32>
    tpu.vector_store %arg5[%c0_8, %c0_9], %10 {strides = array<i32>} : memref<128x8xf32, #tpu.memory_space<vmem>>, vector<128x8xf32>,
    return
  }
  func.func @transform_0(%arg0: i32) -> (i32, i32) {
    %c0_i32 = arith.constant 0 : i32
    %c0_i32_0 = arith.constant 0 : i32
    return %arg0, %c0_i32 : i32, i32
  }
  func.func @transform_1(%arg0: i32) -> (i32, i32) {
    %c0_i32 = arith.constant 0 : i32
    %c0_i32_0 = arith.constant 0 : i32
    %c0_i32_1 = arith.constant 0 : i32
    return %c0_i32, %c0_i32_0 : i32, i32
  }
  func.func @transform_2(%arg0: i32) -> (i32, i32) {
    %c0_i32 = arith.constant 0 : i32
    %c0_i32_0 = arith.constant 0 : i32
    %c0_i32_1 = arith.constant 0 : i32
    return %c0_i32, %c0_i32_0 : i32, i32
  }
  func.func @transform_3(%arg0: i32) -> (i32, i32) {
    %c0_i32 = arith.constant 0 : i32
    %c0_i32_0 = arith.constant 0 : i32
    %c0_i32_1 = arith.constant 0 : i32
    return %c0_i32, %c0_i32_0 : i32, i32
  }
  func.func @transform_4(%arg0: i32) -> (i32, i32) {
    %c0_i32 = arith.constant 0 : i32
    %c0_i32_0 = arith.constant 0 : i32
    return %arg0, %c0_i32 : i32, i32
  }
}

</mosaic_0001>

<bundles_post_ra>
// kernel: tpu_custom_call.1
= control target key start
LH: loop header
LB: loop body
LE: loop exit
PB: predicated region body
PF: predicated region fallthrough
CT: control target
= control target key end

     0   :  { %vm37_vm0 = vcmask 261120   ;;  %vm207_vm1 = vcmask 64512   ;;  %s465_s1 = inlined_call_operand.vmem [shape: f32[32,8], index: 1, kind: input, shape index: {}]   ;;  %s466_s0 = inlined_call_operand.vmem [shape: f32[128,32], index: 0, kind: input, shape index: {}]   ;;  %s467_s2 = inlined_call_operand.vmem [shape: f32[1,8], index: 2, kind: input, shape index: {}]   ;;  %s468_s3 = inlined_call_operand.vmem [shape: f32[1,8], index: 3, kind: input, shape index: {}]   ;;  %s469_s4 = inlined_call_operand.vmem [shape: f32[128,8], index: 4, kind: output, shape index: {}]  }
   0x1   :  { %v36_v0 = vld [vmem:[%s465_s1 + $0x18] sm:$0xff]  ;;  %v35_v1 = vld [vmem:[%s465_s1 + $0x10] sm:$0xff]  ;;  %v34_v2 = vld [vmem:[%s465_s1 + $0x8] sm:$0xff] }
   0x2   :  { %245 = vmatpush.msra.mxu2 %v36_v0  ;;  %246 = vmatpush.msra.mxu3 %v36_v0  ;;  %v33_v3 = vld [vmem:[%s465_s1] sm:$0xff]  ;;  %v26_v8 = vld [vmem:[%s466_s0 + $0x48] sm:$0xff]  ;;  %v27_v12 = vld [vmem:[%s466_s0 + $0x50] sm:$0xff] }
   0x3   :  { %98 = vmatpush.msra.mxu0 %v36_v0  ;;  %244 = vmatpush.msra.mxu1 %v36_v0  ;;  %v25_v4 = vld [vmem:[%s466_s0 + $0x40] sm:$0xff]  ;;  %v30_v9 = vld [vmem:[%s466_s0 + $0x68] sm:$0xff]  ;;  %v31_v13 = vld [vmem:[%s466_s0 + $0x70] sm:$0xff] }
   0x4   :  { %248 = vmatpush.msra.mxu2 %v35_v1  ;;  %249 = vmatpush.msra.mxu3 %v35_v1  ;;  %v29_v5 = vld [vmem:[%s466_s0 + $0x60] sm:$0xff]  ;;  %v18_v10 = vld [vmem:[%s466_s0 + $0x8] sm:$0xff]  ;;  %v19_v14 = vld [vmem:[%s466_s0 + $0x10] sm:$0xff] }
   0x5   :  { %99 = vmatpush.msra.mxu0 %v35_v1  ;;  %247 = vmatpush.msra.mxu1 %v35_v1  ;;  %v17_v6 = vld [vmem:[%s466_s0] sm:$0xff]  ;;  %v22_v11 = vld [vmem:[%s466_s0 + $0x28] sm:$0xff]  ;;  %v23_v15 = vld [vmem:[%s466_s0 + $0x30] sm:$0xff] }
   0x6   :  { %251 = vmatpush.msra.mxu2 %v34_v2  ;;  %252 = vmatpush.msra.mxu3 %v34_v2  ;;  %v21_v7 = vld [vmem:[%s466_s0 + $0x20] sm:$0xff]  ;;  %v28_v16 = vld [vmem:[%s466_s0 + $0x58] sm:$0xff] }
   0x7   :  { %100 = vmatpush.msra.mxu0 %v34_v2  ;;  %250 = vmatpush.msra.mxu1 %v34_v2  ;;  %v32_v17 = vld [vmem:[%s466_s0 + $0x78] sm:$0xff]  ;;  %v362_v20 = vld [vmem:[%s467_s2] ss:$0 sm:$0xff] }
   0x8   :  { %254 = vmatpush.msra.mxu2 %v33_v3  ;;  %255 = vmatpush.msra.mxu3 %v33_v3  ;;  %v20_v18 = vld [vmem:[%s466_s0 + $0x18] sm:$0xff]  ;;  %v367_v21 = vld [vmem:[%s468_s3] ss:$0 sm:$0xff] }
   0x9   :  { %236 = vmatmul.msk.f32.vlgmr.msra.gmra.mxu2 %vm37_vm0, %v25_v4  ;;  %240 = vmatmul.msk.f32.vlgmr.msra.gmra.mxu3 %vm37_vm0, %v29_v5  ;;  %v24_v19 = vld [vmem:[%s466_s0 + $0x38] sm:$0xff] }
   0xa   :  { %101 = vmatpush.msra.mxu0 %v33_v3  ;;  %253 = vmatpush.msra.mxu1 %v33_v3 }
   0xb   :  { %228 = vmatmul.msk.f32.vlgmr.msra.gmra.mxu0 %vm37_vm0, %v17_v6  ;;  %232 = vmatmul.msk.f32.vlgmr.msra.gmra.mxu1 %vm37_vm0, %v21_v7 }
  0x11   :  { %237 = vmatmul.msk.f32.gmra.mxu2 %vm37_vm0, %v26_v8  ;;  %241 = vmatmul.msk.f32.gmra.mxu3 %vm37_vm0, %v30_v9 }
  0x13   :  { %229 = vmatmul.msk.f32.gmra.mxu0 %vm37_vm0, %v18_v10  ;;  %233 = vmatmul.msk.f32.gmra.mxu1 %vm37_vm0, %v22_v11 }
  0x19   :  { %238 = vmatmul.msk.f32.gmra.mxu2 %vm37_vm0, %v27_v12  ;;  %242 = vmatmul.msk.f32.gmra.mxu3 %vm37_vm0, %v31_v13 }
  0x1b   :  { %230 = vmatmul.msk.f32.gmra.mxu0 %vm37_vm0, %v19_v14  ;;  %234 = vmatmul.msk.f32.gmra.mxu1 %vm37_vm0, %v23_v15 }
  0x21   :  { %239 = vmatmul.msk.f32.gmra.mxu2 %vm37_vm0, %v28_v16  ;;  %243 = vmatmul.msk.f32.gmra.mxu3 %vm37_vm0, %v32_v17 }
  0x23   :  { %231 = vmatmul.msk.f32.gmra.mxu0 %vm37_vm0, %v20_v18  ;;  %235 = vmatmul.msk.f32.gmra.mxu1 %vm37_vm0, %v24_v19 }
  0x88   :  { %v103_v22 = vpop.f32.mrf.mxu0  ;;  %v115_v23 = vpop.f32.mrf.mxu1 }
  0x89   :  { %v155_v24 = vmul.f32 %v362_v20, %v103_v22  ;;  %v159_v25 = vmul.f32 %v362_v20, %v115_v23 }
  0x8b   :  { %v175_v26 = vadd.f32 %v367_v21, %v155_v24  ;;  %v179_v27 = vadd.f32 %v367_v21, %v159_v25 }
  0x8c   :  { %v127_v28 = vpop.f32.mrf.mxu2  ;;  %v139_v29 = vpop.f32.mrf.mxu3 }
  0x8d   :  { %v191_v30 = vmax.f32 %v175_v26, 0.0  ;;  %v195_v31 = vmax.f32 %v179_v27, 0.0  ;;  %v163_v32 = vmul.f32 %v362_v20, %v127_v28  ;;  %v167_v33 = vmul.f32 %v362_v20, %v139_v29 }
  0x8f   :  { %208 = vst.msk [vmem:[%s469_s4] sm:$0xff] %vm207_vm1, %v191_v30  ;;  %v183_v34 = vadd.f32 %v367_v21, %v163_v32  ;;  %v187_v35 = vadd.f32 %v367_v21, %v167_v33 }
  0x90   :  { %212 = vst.msk [vmem:[%s469_s4 + $0x20] sm:$0xff] %vm207_vm1, %v195_v31  ;;  %v106_v36 = vpop.f32.mrf.mxu0  ;;  %v118_v37 = vpop.f32.mrf.mxu1 }
  0x91   :  { %v199_v38 = vmax.f32 %v183_v34, 0.0  ;;  %v203_v39 = vmax.f32 %v187_v35, 0.0  ;;  %v156_v40 = vmul.f32 %v362_v20, %v106_v36  ;;  %v160_v41 = vmul.f32 %v362_v20, %v118_v37 }
  0x93   :  { %216 = vst.msk [vmem:[%s469_s4 + $0x40] sm:$0xff] %vm207_vm1, %v199_v38  ;;  %v176_v42 = vadd.f32 %v367_v21, %v156_v40  ;;  %v180_v43 = vadd.f32 %v367_v21, %v160_v41 }
  0x94   :  { %220 = vst.msk [vmem:[%s469_s4 + $0x60] sm:$0xff] %vm207_vm1, %v203_v39  ;;  %v130_v44 = vpop.f32.mrf.mxu2  ;;  %v142_v45 = vpop.f32.mrf.mxu3 }
  0x95   :  { %v192_v46 = vmax.f32 %v176_v42, 0.0  ;;  %v196_v47 = vmax.f32 %v180_v43, 0.0  ;;  %v164_v48 = vmul.f32 %v362_v20, %v130_v44  ;;  %v168_v49 = vmul.f32 %v362_v20, %v142_v45 }
  0x97   :  { %209 = vst.msk [vmem:[%s469_s4 + $0x8] sm:$0xff] %vm207_vm1, %v192_v46  ;;  %v184_v50 = vadd.f32 %v367_v21, %v164_v48  ;;  %v188_v51 = vadd.f32 %v367_v21, %v168_v49 }
  0x98   :  { %213 = vst.msk [vmem:[%s469_s4 + $0x28] sm:$0xff] %vm207_vm1, %v196_v47  ;;  %v109_v52 = vpop.f32.mrf.mxu0  ;;  %v121_v53 = vpop.f32.mrf.mxu1 }
  0x99   :  { %v200_v54 = vmax.f32 %v184_v50, 0.0  ;;  %v204_v55 = vmax.f32 %v188_v51, 0.0  ;;  %v157_v56 = vmul.f32 %v362_v20, %v109_v52  ;;  %v161_v57 = vmul.f32 %v362_v20, %v121_v53 }
  0x9b   :  { %217 = vst.msk [vmem:[%s469_s4 + $0x48] sm:$0xff] %vm207_vm1, %v200_v54  ;;  %v177_v58 = vadd.f32 %v367_v21, %v157_v56  ;;  %v181_v59 = vadd.f32 %v367_v21, %v161_v57 }
  0x9c   :  { %221 = vst.msk [vmem:[%s469_s4 + $0x68] sm:$0xff] %vm207_vm1, %v204_v55  ;;  %v133_v60 = vpop.f32.mrf.mxu2  ;;  %v145_v61 = vpop.f32.mrf.mxu3 }
  0x9d   :  { %v193_v62 = vmax.f32 %v177_v58, 0.0  ;;  %v197_v63 = vmax.f32 %v181_v59, 0.0  ;;  %v165_v0 = vmul.f32 %v362_v20, %v133_v60  ;;  %v169_v1 = vmul.f32 %v362_v20, %v145_v61 }
  0x9f   :  { %210 = vst.msk [vmem:[%s469_s4 + $0x10] sm:$0xff] %vm207_vm1, %v193_v62  ;;  %v185_v2 = vadd.f32 %v367_v21, %v165_v0  ;;  %v189_v3 = vadd.f32 %v367_v21, %v169_v1 }
  0xa0   :  { %214 = vst.msk [vmem:[%s469_s4 + $0x30] sm:$0xff] %vm207_vm1, %v197_v63  ;;  %v112_v4 = vpop.f32.mrf.mxu0  ;;  %v124_v5 = vpop.f32.mrf.mxu1 }
  0xa1   :  { %v201_v6 = vmax.f32 %v185_v2, 0.0  ;;  %v205_v7 = vmax.f32 %v189_v3, 0.0  ;;  %v158_v8 = vmul.f32 %v362_v20, %v112_v4  ;;  %v162_v9 = vmul.f32 %v362_v20, %v124_v5 }
  0xa3   :  { %218 = vst.msk [vmem:[%s469_s4 + $0x50] sm:$0xff] %vm207_vm1, %v201_v6  ;;  %v178_v10 = vadd.f32 %v367_v21, %v158_v8  ;;  %v182_v11 = vadd.f32 %v367_v21, %v162_v9 }
  0xa4   :  { %222 = vst.msk [vmem:[%s469_s4 + $0x70] sm:$0xff] %vm207_vm1, %v205_v7  ;;  %v136_v12 = vpop.f32.mrf.mxu2  ;;  %v148_v13 = vpop.f32.mrf.mxu3 }
  0xa5   :  { %v194_v14 = vmax.f32 %v178_v10, 0.0  ;;  %v198_v15 = vmax.f32 %v182_v11, 0.0  ;;  %v166_v16 = vmul.f32 %v362_v20, %v136_v12  ;;  %v170_v17 = vmul.f32 %v362_v20, %v148_v13 }
  0xa7   :  { %211 = vst.msk [vmem:[%s469_s4 + $0x18] sm:$0xff] %vm207_vm1, %v194_v14  ;;  %v186_v18 = vadd.f32 %v367_v21, %v166_v16  ;;  %v190_v19 = vadd.f32 %v367_v21, %v170_v17 }
  0xa8   :  { %215 = vst.msk [vmem:[%s469_s4 + $0x38] sm:$0xff] %vm207_vm1, %v198_v15 }
  0xa9   :  { %v202_v22 = vmax.f32 %v186_v18, 0.0  ;;  %v206_v23 = vmax.f32 %v190_v19, 0.0 }
  0xab   :  { %219 = vst.msk [vmem:[%s469_s4 + $0x58] sm:$0xff] %vm207_vm1, %v202_v22 }
  0xac   :  { %223 = vst.msk [vmem:[%s469_s4 + $0x78] sm:$0xff] %vm207_vm1, %v206_v23 }

</bundles_post_ra>
